<compile_context>
chip_gen: v7x
topology: tpu7x:2x2x1
jax: 0.10.0
libtpu: 0.0.40
codegen_flags: <defaults>
</compile_context>

<pallas_src>
import functools

import jax
import jax.numpy as jnp
from jax.experimental import pallas as pl
from jax.experimental.pallas import tpu as pltpu


def _cdiv(a, b):
    return -(-a // b)


def _round_up(v, m):
    return ((v + m - 1) // m) * m


def _balanced_tile(dim, target, align):
    """Tile ~<= target covering `dim` in ceil(dim/target) pieces (bounded padding waste).

    If dim <= target the whole dim is one (full-extent) block, which is legal regardless
    of (8, 128) alignment.
    """
    if dim <= target:
        return dim
    n_tiles = _cdiv(dim, target)
    return _round_up(_cdiv(dim, n_tiles), align)


def _vmem_capacity_bytes():
    try:
        return int(pltpu.get_tpu_info().vmem_capacity_bytes)
    except Exception:
        return 64 * 1024 * 1024  # conservative default: v7x per-TensorCore VMEM


# --------------------------- kernel bodies ---------------------------
# Full-K: single resident contraction slab; no K grid axis, no accumulator scratch.

def _fullk_bias_kernel(x_ref, w_ref, b_ref, o_ref):
    acc = jnp.dot(x_ref[...], w_ref[...], preferred_element_type=jnp.float32)
    o_ref[...] = (acc + b_ref[...].astype(jnp.float32)).astype(o_ref.dtype)


def _fullk_nobias_kernel(x_ref, w_ref, o_ref):
    o_ref[...] = jnp.dot(
        x_ref[...], w_ref[...], preferred_element_type=jnp.float32
    ).astype(o_ref.dtype)


# Multi-K fallback: K innermost ("arbitrary"), f32 scratch accumulator.

def _multik_bias_kernel(x_ref, w_ref, b_ref, o_ref, acc_ref):
    k = pl.program_id(3)
    prod = jnp.dot(x_ref[...], w_ref[...], preferred_element_type=jnp.float32)

    @pl.when(k == 0)
    def _():
        acc_ref[...] = prod

    @pl.when(k != 0)
    def _():
        acc_ref[...] = acc_ref[...] + prod

    @pl.when(k == pl.num_programs(3) - 1)
    def _():
        o_ref[...] = (acc_ref[...] + b_ref[...].astype(jnp.float32)
                      ).astype(o_ref.dtype)


def _multik_nobias_kernel(x_ref, w_ref, o_ref, acc_ref):
    k = pl.program_id(3)
    prod = jnp.dot(x_ref[...], w_ref[...], preferred_element_type=jnp.float32)

    @pl.when(k == 0)
    def _():
        acc_ref[...] = prod

    @pl.when(k != 0)
    def _():
        acc_ref[...] = acc_ref[...] + prod

    @pl.when(k == pl.num_programs(3) - 1)
    def _():
        o_ref[...] = acc_ref[...].astype(o_ref.dtype)


# --------------------------- wrapper ---------------------------

@functools.partial(jax.jit, static_argnames=(
    "tm_target", "tn_target", "tk_target", "vmem_tile_budget_bytes"))
def hfta_linear(x, weight, bias=None, *,
                tm_target=512, tn_target=512, tk_target=2048,
                vmem_tile_budget_bytes=None):
    """Fused-model Linear: x [B, *, in], weight [B, in, out], bias [B, 1, out] or None."""
    B, K, N = weight.shape
    old_shape = x.shape
    assert old_shape[0] == B and old_shape[-1] == K
    x3 = x.reshape(B, -1, K)                 # [B, M, K]
    M = x3.shape[1]

    out_dtype = x.dtype
    itemsize = jnp.dtype(out_dtype).itemsize

    cap = _vmem_capacity_bytes()
    if vmem_tile_budget_bytes is None:
        # ~40% of physical VMEM for the double-buffered working set, capped at 48 MiB.
        budget = min(48 << 20, max(8 << 20, int(cap * 0.40)))
    else:
        budget = int(vmem_tile_budget_bytes)

    # ---- M / N tiling: no M padding (edge blocks are masked); weight/bias padded in N
    #      so the output store stays lane-dense. Balanced tiles bound padding waste. ----
    tm = _balanced_tile(M, tm_target, 8)
    Np = _round_up(N, 128)
    tn = _balanced_tile(Np, tn_target, 128)

    bias_bytes = (2 * tn * itemsize) if bias is not None else 0

    def _fullk_bytes(tk_):
        return 2 * (tm * tk_ + tk_ * tn + tm * tn) * itemsize + bias_bytes

    full_k = _fullk_bytes(K) <= budget

    if full_k:
        tk, Kp = K, K
    else:
        acc_bytes = tm * tn * 4
        avail = budget - 2 * tm * tn * itemsize - acc_bytes - bias_bytes
        tk_cap = avail // (2 * (tm + tn) * itemsize) if avail > 0 else 0
        tk_cap = (tk_cap // 128) * 128
        tk_cap = max(128, min(tk_target, tk_cap))
        Kp0 = _round_up(K, 128)
        n_k = _cdiv(Kp0, tk_cap)
        tk = _round_up(_cdiv(Kp0, n_k), 128)
        Kp = n_k * tk

    # ---- padding (weights / bias only in the common path) ----
    w = weight
    b3 = bias
    if Np != N:
        w = jnp.pad(w, ((0, 0), (0, 0), (0, Np - N)))
        if b3 is not None:
            b3 = jnp.pad(b3, ((0, 0), (0, 0), (0, Np - N)))
    if (not full_k) and Kp != K:
        x3 = jnp.pad(x3, ((0, 0), (0, 0), (0, Kp - K)))
        w = jnp.pad(w, ((0, 0), (0, Kp - K), (0, 0)))

    # ---- grid / specs ----
    if full_k:
        grid = (B, _cdiv(Np, tn), _cdiv(M, tm))
        # Weight block depends only on (b, j): constant across the inner M axis, so Pallas
        # keeps it resident instead of re-DMA'ing it.
        x_spec = pl.BlockSpec((None, tm, K), lambda b, j, i: (b, i, 0))
        w_spec = pl.BlockSpec((None, K, tn), lambda b, j, i: (b, 0, j))
        o_spec = pl.BlockSpec((None, tm, tn), lambda b, j, i: (b, i, j))
        dims = ("parallel", "parallel", "parallel")
        scratch = []
        if bias is not None:
            b_spec = pl.BlockSpec((None, 1, tn), lambda b, j, i: (b, 0, j))
            kernel, in_specs, operands = (_fullk_bias_kernel,
                                          [x_spec, w_spec, b_spec], (x3, w, b3))
        else:
            kernel, in_specs, operands = (_fullk_nobias_kernel,
                                          [x_spec, w_spec], (x3, w))
    else:
        grid = (B, _cdiv(Np, tn), _cdiv(M, tm), Kp // tk)
        x_spec = pl.BlockSpec((None, tm, tk), lambda b, j, i, k: (b, i, k))
        w_spec = pl.BlockSpec((None, tk, tn), lambda b, j, i, k: (b, k, j))
        o_spec = pl.BlockSpec((None, tm, tn), lambda b, j, i, k: (b, i, j))
        dims = ("parallel", "parallel", "parallel", "arbitrary")
        scratch = [pltpu.VMEM((tm, tn), jnp.float32)]
        if bias is not None:
            b_spec = pl.BlockSpec((None, 1, tn), lambda b, j, i, k: (b, 0, j))
            kernel, in_specs, operands = (_multik_bias_kernel,
                                          [x_spec, w_spec, b_spec], (x3, w, b3))
        else:
            kernel, in_specs, operands = (_multik_nobias_kernel,
                                          [x_spec, w_spec], (x3, w))

    # ---- VMEM limit: actual working set + headroom, never above physical - 8 MiB ----
    est = 2 * (tm * tk + tk * tn + tm * tn) * itemsize + bias_bytes
    if not full_k:
        est += tm * tn * 4
    vmem_limit = int(max(32 << 20, est + (8 << 20)))
    vmem_limit = int(min(vmem_limit, max(32 << 20, cap - (8 << 20))))

    out = pl.pallas_call(
        kernel,
        out_shape=jax.ShapeDtypeStruct((B, M, Np), out_dtype),
        grid_spec=pltpu.PrefetchScalarGridSpec(
            num_scalar_prefetch=0,
            grid=grid,
            in_specs=in_specs,
            out_specs=o_spec,
            scratch_shapes=scratch,
        ),
        compiler_params=pltpu.CompilerParams(
            dimension_semantics=dims,
            vmem_limit_bytes=vmem_limit),
    )(*operands)

    if Np != N:
        out = out[:, :, :N]
    return out.reshape(old_shape[:-1] + (N,))


if __name__ == "__main__":
    # Small shapes consistent with the module: B fused models, input [B, batch, seq, in].
    B = 2
    batch = 4
    seq = 8
    in_features = 32
    out_features = 32

    key = jax.random.PRNGKey(0)
    kx, kw, kb = jax.random.split(key, 3)

    x = jax.random.normal(kx, (B, batch, seq, in_features), dtype=jnp.float32)
    # Deterministic parameter init (kaiming-uniform-ish bounds, synthetic values).
    w_bound = (6.0 / out_features) ** 0.5 / (1.0 + 5.0) ** 0.5
    weight = jax.random.uniform(
        kw, (B, in_features, out_features), minval=-w_bound, maxval=w_bound,
        dtype=jnp.float32)
    b_bound = 1.0 / (out_features ** 0.5)
    bias = jax.random.uniform(
        kb, (B, 1, out_features), minval=-b_bound, maxval=b_bound,
        dtype=jnp.float32)

    x3 = x.reshape(B, -1, in_features)
    ref_b = (jnp.einsum("bmk,bkn->bmn", x3, weight) + bias).reshape(
        B, batch, seq, out_features)
    ref_nb = jnp.einsum("bmk,bkn->bmn", x3, weight).reshape(
        B, batch, seq, out_features)

    # 1) Full-K resident path, with bias (torch.baddbmm branch).
    y = jax.block_until_ready(hfta_linear(x, weight, bias))
    assert y.shape == (B, batch, seq, out_features)
    assert jnp.allclose(y, ref_b, atol=1e-5, rtol=1e-5)

    # 2) Full-K resident path, no bias (torch.bmm branch).
    y2 = jax.block_until_ready(hfta_linear(x, weight, None))
    assert jnp.allclose(y2, ref_nb, atol=1e-5, rtol=1e-5)

    # 3) Multi-K fallback path: force a tiny VMEM tile budget so K is tiled (3 x 128),
    #    with odd M / non-128 N to exercise edge-block masking and N padding.
    kx2, kw2, kb2 = jax.random.split(jax.random.PRNGKey(1), 3)
    K2, N2, M2a, M2b = 384, 96, 3, 7
    x_big = jax.random.normal(kx2, (B, M2a, M2b, K2), dtype=jnp.float32)
    w_big = jax.random.normal(kw2, (B, K2, N2), dtype=jnp.float32) * 0.05
    b_big = jax.random.normal(kb2, (B, 1, N2), dtype=jnp.float32) * 0.05
    y3 = jax.block_until_ready(
        hfta_linear(x_big, w_big, b_big, vmem_tile_budget_bytes=256 * 1024))
    ref3 = (jnp.einsum("bmk,bkn->bmn", x_big.reshape(B, -1, K2), w_big)
            + b_big).reshape(B, M2a, M2b, N2)
    assert y3.shape == (B, M2a, M2b, N2)
    assert jnp.allclose(y3, ref3, atol=1e-4, rtol=1e-4)

    print("KERNEL_OK")
</pallas_src>

<mosaic_0001>
module attributes {stable_mosaic.version = 11 : i64} {
  func.func @_fullk_bias_kernel(%arg0: i32, %arg1: i32, %arg2: i32, %arg3: memref<1x32x32xf32, #tpu.memory_space<vmem>>, %arg4: memref<1x32x128xf32, #tpu.memory_space<vmem>>, %arg5: memref<1x1x128xf32, #tpu.memory_space<vmem>>, %arg6: memref<1x32x128xf32, #tpu.memory_space<vmem>>) attributes {dimension_semantics = [#tpu.dimension_semantics<parallel>, #tpu.dimension_semantics<parallel>, #tpu.dimension_semantics<parallel>], iteration_bounds = array<i64: 2, 1, 1>, scalar_prefetch = 0 : i64, scratch_operands = 0 : i64, tpu.core_type = #tpu.core_type<tc>, window_params = [{transform_indices = @transform_0, window_bounds = array<i64: 1, 32, 32>}, {transform_indices = @transform_1, window_bounds = array<i64: 1, 32, 128>}, {transform_indices = @transform_2, window_bounds = array<i64: 1, 1, 128>}, {transform_indices = @transform_3, window_bounds = array<i64: 1, 32, 128>}]} {
    %c0 = arith.constant 0 : index
    %c0_0 = arith.constant 0 : index
    %c0_1 = arith.constant 0 : index
    %0 = vector.load %arg3[%c0, %c0_0, %c0_1] : memref<1x32x32xf32, #tpu.memory_space<vmem>>, vector<1x32x32xf32>
    %1 = vector.shape_cast %0 : vector<1x32x32xf32> to vector<32x32xf32>
    %c0_2 = arith.constant 0 : index
    %c0_3 = arith.constant 0 : index
    %c0_4 = arith.constant 0 : index
    %2 = vector.load %arg4[%c0_2, %c0_3, %c0_4] : memref<1x32x128xf32, #tpu.memory_space<vmem>>, vector<1x32x128xf32>
    %3 = vector.shape_cast %2 : vector<1x32x128xf32> to vector<32x128xf32>
    %cst = arith.constant dense<0.000000e+00> : vector<32x128xf32>
    %4 = tpu.matmul %1, %3, %cst {dimension_numbers = #tpu.dot_dimension_numbers<[1], [0], [0], [1], [0, 0, 1, 1], [], []>} : vector<32x32xf32>, vector<32x128xf32>, vector<32x128xf32> -> vector<32x128xf32>
    %c0_5 = arith.constant 0 : index
    %c0_6 = arith.constant 0 : index
    %c0_7 = arith.constant 0 : index
    %5 = vector.load %arg5[%c0_5, %c0_6, %c0_7] : memref<1x1x128xf32, #tpu.memory_space<vmem>>, vector<1x1x128xf32>
    %6 = vector.shape_cast %5 : vector<1x1x128xf32> to vector<1x128xf32>
    %7 = vector.broadcast %6 : vector<1x128xf32> to vector<32x128xf32>
    %8 = arith.addf %4, %7 : vector<32x128xf32>
    %c0_8 = arith.constant 0 : index
    %c0_9 = arith.constant 0 : index
    %c0_10 = arith.constant 0 : index
    %9 = vector.load %arg6[%c0_8, %c0_9, %c0_10] : memref<1x32x128xf32, #tpu.memory_space<vmem>>, vector<1x32x128xf32>
    %10 = vector.shape_cast %9 : vector<1x32x128xf32> to vector<32x128xf32>
    %11 = vector.shape_cast %8 : vector<32x128xf32> to vector<1x32x128xf32>
    tpu.vector_store %arg6[%c0_8, %c0_9, %c0_10], %11 {strides = array<i32>} : memref<1x32x128xf32, #tpu.memory_space<vmem>>, vector<1x32x128xf32>,
    return
  }
  func.func @transform_0(%arg0: i32, %arg1: i32, %arg2: i32) -> (i32, i32, i32) {
    %c0_i32 = arith.constant 0 : i32
    %c0_i32_0 = arith.constant 0 : i32
    return %arg0, %arg2, %c0_i32 : i32, i32, i32
  }
  func.func @transform_1(%arg0: i32, %arg1: i32, %arg2: i32) -> (i32, i32, i32) {
    %c0_i32 = arith.constant 0 : i32
    %c0_i32_0 = arith.constant 0 : i32
    return %arg0, %c0_i32, %arg1 : i32, i32, i32
  }
  func.func @transform_2(%arg0: i32, %arg1: i32, %arg2: i32) -> (i32, i32, i32) {
    %c0_i32 = arith.constant 0 : i32
    %c0_i32_0 = arith.constant 0 : i32
    return %arg0, %c0_i32, %arg1 : i32, i32, i32
  }
  func.func @transform_3(%arg0: i32, %arg1: i32, %arg2: i32) -> (i32, i32, i32) {
    %c0_i32 = arith.constant 0 : i32
    return %arg0, %arg2, %arg1 : i32, i32, i32
  }
}

</mosaic_0001>

<bundles_post_ra>
// kernel: hfta_linear.1
= control target key start
LH: loop header
LB: loop body
LE: loop exit
PB: predicated region body
PF: predicated region fallthrough
CT: control target
= control target key end

     0   :  { %s651_s12 = smov 0   ;;  %s653_s13 = smov 0   ;;  %s694_s0 = inlined_call_operand.vmem [shape: f32[2,32,32], index: 0, kind: input, shape index: {}]   ;;  %s695_s1 = inlined_call_operand.vmem [shape: f32[2,32,128], index: 1, kind: input, shape index: {}]   ;;  %s696_s2 = inlined_call_operand.vmem [shape: f32[2,1,128], index: 2, kind: input, shape index: {}]   ;;  %s697_s3 = inlined_call_operand.vmem [shape: f32[2,32,128], index: 3, kind: output, shape index: {}]  }
   0x1   :  { %s655_s14 = smov 0  }
   0x2 LB: > { %s32_s15 = sadd.s32 1, %s625_s13  ;;  %p532_p0 = scmp.ge.s32.totalorder %s629_s14, 1  ;;  %s629_s14 = sphi %s655_s14, %s13_s14   ;;  %s625_s13 = sphi %s653_s13, %s699_s13   ;;  %s621_s12 = sphi %s651_s12, %s698_s12  }
   0x3   : > { %p34_p1 = scmp.ge.s32.totalorder %s32_s15, 2  ;;  %p195_p2 = scmp.lt.s32.totalorder %s629_s14, 3 }
   0x5   : > { %s701_s15 = smov (%p34_p1, %s32_s15), 0  ;;  %p196_p3 = pnand %p532_p0, %p195_p2 }
   0x6   : > { %p245_p4 = scmp.lt.s32.totalorder (!%p196_p3), %s621_s12, 1  ;;  %vm296_vm0 = vcmask (!%p196_p3), 261120  }
   0x7   : > { %199 = sbr.rel (%p196_p3) target bundleno = 244 (0xf4), region = 32 }
   0xe   : > { %s703_s12 = smov (!%p245_p4, %s621_s12), 1 }
   0xf   : > { %s546_s16 = sshll.u32 %s703_s12, 5  ;;  %s267_s25 = scalar_lea.vmem %s696_s2, %s703_s12 }
  0x10   : > { %s261_s19 = scalar_lea.vmem %s695_s1, %s546_s16  ;;  %s252_s22 = scalar_lea.vmem %s694_s0, %s546_s16  ;;  %v539_v10 = vld [vmem:[%s267_s25] ss:$0 sm:$0xff] }
  0x11   : > { %v285_v0 = vld [vmem:[%s261_s19] sm:$0xff]  ;;  %v286_v1 = vld [vmem:[%s261_s19 + $0x8] sm:$0xff]  ;;  %v287_v2 = vld [vmem:[%s261_s19 + $0x10] sm:$0xff]  ;;  %s279_s28 = scalar_lea.vmem %s697_s3, %s546_s16 }
  0x12   : > { %v571_v3 = vpack.c.bf16 %v286_v1, %v285_v0  ;;  %v288_v4 = vld [vmem:[%s261_s19 + $0x18] sm:$0xff]  ;;  %v281_v5 = vld [vmem:[%s252_s22] sm:$0xff]  ;;  %v283_v6 = vld [vmem:[%s252_s22 + $0x10] sm:$0xff] }
  0x13   : > { %v575_v7 = vpack.c.bf16 %v288_v4, %v287_v2  ;;  %565 = vmatprep.mubr.msk.f32.mxu0 %vm296_vm0, %v281_v5  ;;  %568 = vmatprep.mubr.msk.f32.mxu1 %vm296_vm0, %v283_v6  ;;  %v282_v8 = vld [vmem:[%s252_s22 + $0x8] sm:$0xff]  ;;  %v284_v9 = vld [vmem:[%s252_s22 + $0x18] sm:$0xff] }
  0x14   : > { %572 = vmatprep.subr.bf16.mxu0 %v571_v3  ;;  %579 = vmatprep.subr.bf16.mxu1 %v571_v3 }
  0x15   : > { %574 = vmatpush3.bf16.msra.mxu0 %v571_v3  ;;  %581 = vmatpush3.bf16.msra.mxu1 %v571_v3 }
  0x16   : > { %576 = vmatprep.subr.bf16.mxu0 %v575_v7  ;;  %580 = vmatprep.subr.bf16.mxu1 %v575_v7 }
  0x19   : > { %578 = vmatpush3.bf16.msra.mxu0 %v575_v7  ;;  %582 = vmatpush3.bf16.msra.mxu1 %v575_v7 }
  0x1c   : > { %566 = vmatmul.mubr.msk.f32.vlgmr.msra.gmra.mrb[0].mxu0 %vm296_vm0, %v282_v8  ;;  %569 = vmatmul.mubr.msk.f32.vlgmr.msra.gmra.mrb[0].mxu1 %vm296_vm0, %v284_v9 }
  0xef   : > { %v567_v11 = vpop.f32.mrb[0].mxu0  ;;  %v570_v12 = vpop.f32.mrb[0].mxu1 }
  0xf0   : > { %v381_v13 = vadd.f32 %v567_v11, %v539_v10  ;;  %v391_v14 = vadd.f32 %v570_v12, %v539_v10  ;;  %v375_v15 = vpop.f32.mrb[1].mxu0  ;;  %v385_v16 = vpop.f32.mrb[1].mxu1 }
  0xf1   : > { %v376_v17 = vadd.f32 %v539_v10, %v375_v15  ;;  %v386_v18 = vadd.f32 %v539_v10, %v385_v16 }
  0xf2   : > { %395 = vst [vmem:[%s279_s28 + $0x8] sm:$0xff] %v381_v13  ;;  %397 = vst [vmem:[%s279_s28 + $0x18] sm:$0xff] %v391_v14 }
  0xf3   : > { %394 = vst [vmem:[%s279_s28] sm:$0xff] %v376_v17  ;;  %396 = vst [vmem:[%s279_s28 + $0x10] sm:$0xff] %v386_v18 }
  0xf4 PF: > { %s13_s14 = sadd.s32 1, %s629_s14   ;;  %s698_s12 = smov %s625_s13 }
  0xf5   : > { %p10_p5 = scmp.ge.s32.totalorder %s13_s14, 4   ;;  %s699_s13 = smov %s701_s15 }
  0xf7   :  { %12 = sbr.rel (!%p10_p5) target bundleno = 2 (0x2), region = 68 }

</bundles_post_ra>
